<compile_context>
chip_gen: v5e
topology: v5e:2x2
jax: 0.10.0
libtpu: 0.0.40
codegen_flags: <defaults>
</compile_context>

<pallas_src>
import math

import jax
import jax.numpy as jnp
from jax import lax
from jax.experimental import pallas as pl
from jax.experimental.pallas import tpu as pltpu


def _make_conv_agg_kernel(K, Q):
    def kernel(w_ref, b_ref, p_ref, o_ref):
        # w_ref: (K,)              SMEM  flattened conv kernel (scalars)
        # b_ref: (1,)              SMEM  conv bias
        # p_ref: (K, Q, TMr, 128)  VMEM  lane-dense im2col patches
        # o_ref: (TMr, 128)        VMEM  pooled output tile (lane-dense)
        ws = [w_ref[k] for k in range(K)]          # scalar loads, hoisted
        m = None
        for q in range(Q):                         # unrolled pool window
            s = ws[0] * p_ref[0, q, :, :]
            for k in range(1, K):                  # unrolled taps: scalar*vector FMA
                s = s + ws[k] * p_ref[k, q, :, :]
            m = s if q == 0 else jnp.maximum(m, s)
        # Max-pool before bias+tanh: exact (both monotonic), 4x fewer tanh/adds.
        o_ref[...] = jnp.tanh(m + b_ref[0])
        # TODO(synk): Dropout(p=0.0) is identity; for p>0 seed pltpu.prng_seed per
        # grid step and apply pltpu.stateful_bernoulli here.
    return kernel


def conv_aggregation(x, w, b, *, kernel_size=(3, 3), stride=(2, 2),
                     max_pool_size=(2, 2)):
    """x: (N, H, W) float32, w: (kh, kw), b: scalar. Returns (N, Hp, Wp)."""
    N, H, W = x.shape
    kh, kw = kernel_size
    sh, sw = stride
    ph, pw = max_pool_size

    Hc = (H - kh) // sh + 1          # conv output height (VALID)
    Wc = (W - kw) // sw + 1
    Hp, Wp = Hc // ph, Wc // pw      # max-pool output (floor, like MaxPool2d)
    K, Q, L = kh * kw, ph * pw, Hp * Wp
    P = N * L                        # flattened pixel axis (batch x pooled pos)

    # Lane-dense tiling of the flattened pixel axis.
    LANES = 128
    Mr = pl.cdiv(P, LANES)           # number of 128-lane rows needed
    TMr = min(64, Mr)                # ~1.2 MiB input block per step at TMr=64
    n_tiles = pl.cdiv(Mr, TMr)
    Mr_pad = n_tiles * TMr
    M = Mr_pad * LANES

    # ---- glue (plain JAX): strided tap extraction, pool-major, lane-dense ----
    # TODO(synk): the window extraction could be folded into the kernel (raw x
    # tiles + in-VMEM stride-2 decimation) to remove this intermediate entirely.
    cols = []
    for di in range(kh):
        for dj in range(kw):
            cols.append(x[:, di:di + sh * (Hc - 1) + 1:sh,
                            dj:dj + sw * (Wc - 1) + 1:sw])
    taps = jnp.stack(cols, axis=0)                          # (K, N, Hc, Wc)
    taps = taps[:, :, :Hp * ph, :Wp * pw]                   # drop ragged pool edge
    taps = taps.reshape(K, N, Hp, ph, Wp, pw)
    taps = taps.transpose(0, 3, 5, 1, 2, 4).reshape(K, Q, P)  # (K, Q, N*Hp*Wp)
    taps = jnp.pad(taps, ((0, 0), (0, 0), (0, M - P)))
    patches = taps.reshape(K, Q, Mr_pad, LANES).astype(jnp.float32)

    w_flat = jnp.reshape(w, (K,)).astype(jnp.float32)
    b_arr = jnp.reshape(b, (1,)).astype(jnp.float32)

    # ---- Pallas hot path: grid over lane-dense pixel tiles ----
    out = pl.pallas_call(
        _make_conv_agg_kernel(K, Q),
        out_shape=jax.ShapeDtypeStruct((Mr_pad, LANES), jnp.float32),
        grid=(n_tiles,),
        in_specs=[
            pl.BlockSpec(memory_space=pltpu.MemorySpace.SMEM),        # weights
            pl.BlockSpec(memory_space=pltpu.MemorySpace.SMEM),        # bias
            pl.BlockSpec((K, Q, TMr, LANES), lambda i: (0, 0, i, 0)), # patches
        ],
        out_specs=pl.BlockSpec((TMr, LANES), lambda i: (i, 0)),
        compiler_params=pltpu.CompilerParams(
            dimension_semantics=("parallel",),
            vmem_limit_bytes=32 << 20),
    )(w_flat, b_arr, patches)

    return out.reshape(M)[:P].reshape(N, Hp, Wp)


def _reference(x, w, b, kernel_size, stride, max_pool_size):
    """Pure-JAX reference mirroring the PyTorch forward (NCHW)."""
    xc = x[:, None, :, :]                                   # (N, 1, H, W)
    wf = jnp.reshape(w, (1, 1) + kernel_size)               # (O, I, kh, kw)
    conv = lax.conv_general_dilated(
        xc, wf, stride, "VALID",
        dimension_numbers=("NCHW", "OIHW", "NCHW")) + b
    act = jnp.tanh(conv)
    pooled = lax.reduce_window(
        act, -jnp.inf, lax.max,
        (1, 1) + max_pool_size, (1, 1) + max_pool_size, "VALID")
    return pooled[:, 0]                                     # squeeze channel


if __name__ == "__main__":
    key = jax.random.PRNGKey(0)
    key_x, key_w, key_b = jax.random.split(key, 3)

    N, H, W = 2, 16, 16
    kh, kw = 3, 3
    # Deterministic Conv2d-style init (uniform in +/- 1/sqrt(fan_in)).
    bound = 1.0 / math.sqrt(kh * kw * 1)
    w = jax.random.uniform(key_w, (kh, kw), jnp.float32, -bound, bound)
    b = jax.random.uniform(key_b, (), jnp.float32, -bound, bound)
    x = jax.random.normal(key_x, (N, H, W), jnp.float32)

    out = conv_aggregation(x, w, b)
    out = jax.block_until_ready(out)

    ref = _reference(x, w, b, (kh, kw), (2, 2), (2, 2))
    assert out.shape == ref.shape, (out.shape, ref.shape)
    assert jnp.allclose(out, ref, atol=1e-4, rtol=1e-4), \
        float(jnp.max(jnp.abs(out - ref)))

    print("KERNEL_OK")
</pallas_src>

<mosaic_0001>
module attributes {stable_mosaic.version = 11 : i64} {
  func.func @kernel(%arg0: i32, %arg1: memref<9xf32, #tpu.memory_space<smem>>, %arg2: memref<1xf32, #tpu.memory_space<smem>>, %arg3: memref<9x4x1x128xf32, #tpu.memory_space<vmem>>, %arg4: memref<1x128xf32, #tpu.memory_space<vmem>>) attributes {dimension_semantics = [#tpu.dimension_semantics<parallel>], iteration_bounds = array<i64: 1>, scalar_prefetch = 0 : i64, scratch_operands = 0 : i64, tpu.core_type = #tpu.core_type<tc>, window_params = [{transform_indices = @transform_0, window_bounds = array<i64: 9>}, {transform_indices = @transform_1, window_bounds = array<i64: 1>}, {transform_indices = @transform_2, window_bounds = array<i64: 9, 4, 1, 128>}, {transform_indices = @transform_3, window_bounds = array<i64: 1, 128>}]} {
    %c0 = arith.constant 0 : index
    %0 = memref.load %arg1[%c0] : memref<9xf32, #tpu.memory_space<smem>>
    %c1 = arith.constant 1 : index
    %1 = memref.load %arg1[%c1] : memref<9xf32, #tpu.memory_space<smem>>
    %c2 = arith.constant 2 : index
    %2 = memref.load %arg1[%c2] : memref<9xf32, #tpu.memory_space<smem>>
    %c3 = arith.constant 3 : index
    %3 = memref.load %arg1[%c3] : memref<9xf32, #tpu.memory_space<smem>>
    %c4 = arith.constant 4 : index
    %4 = memref.load %arg1[%c4] : memref<9xf32, #tpu.memory_space<smem>>
    %c5 = arith.constant 5 : index
    %5 = memref.load %arg1[%c5] : memref<9xf32, #tpu.memory_space<smem>>
    %c6 = arith.constant 6 : index
    %6 = memref.load %arg1[%c6] : memref<9xf32, #tpu.memory_space<smem>>
    %c7 = arith.constant 7 : index
    %7 = memref.load %arg1[%c7] : memref<9xf32, #tpu.memory_space<smem>>
    %c8 = arith.constant 8 : index
    %8 = memref.load %arg1[%c8] : memref<9xf32, #tpu.memory_space<smem>>
    %c0_0 = arith.constant 0 : index
    %c0_1 = arith.constant 0 : index
    %c0_2 = arith.constant 0 : index
    %c0_3 = arith.constant 0 : index
    %9 = vector.load %arg3[%c0_0, %c0_1, %c0_2, %c0_3] : memref<9x4x1x128xf32, #tpu.memory_space<vmem>>, vector<1x1x1x128xf32>
    %10 = vector.shape_cast %9 : vector<1x1x1x128xf32> to vector<1x128xf32>
    %11 = vector.broadcast %0 : f32 to vector<1x128xf32>
    %12 = arith.mulf %11, %10 : vector<1x128xf32>
    %c1_4 = arith.constant 1 : index
    %c0_5 = arith.constant 0 : index
    %c0_6 = arith.constant 0 : index
    %c0_7 = arith.constant 0 : index
    %13 = vector.load %arg3[%c1_4, %c0_5, %c0_6, %c0_7] : memref<9x4x1x128xf32, #tpu.memory_space<vmem>>, vector<1x1x1x128xf32>
    %14 = vector.shape_cast %13 : vector<1x1x1x128xf32> to vector<1x128xf32>
    %15 = vector.broadcast %1 : f32 to vector<1x128xf32>
    %16 = arith.mulf %15, %14 : vector<1x128xf32>
    %17 = arith.addf %12, %16 : vector<1x128xf32>
    %c2_8 = arith.constant 2 : index
    %c0_9 = arith.constant 0 : index
    %c0_10 = arith.constant 0 : index
    %c0_11 = arith.constant 0 : index
    %18 = vector.load %arg3[%c2_8, %c0_9, %c0_10, %c0_11] : memref<9x4x1x128xf32, #tpu.memory_space<vmem>>, vector<1x1x1x128xf32>
    %19 = vector.shape_cast %18 : vector<1x1x1x128xf32> to vector<1x128xf32>
    %20 = vector.broadcast %2 : f32 to vector<1x128xf32>
    %21 = arith.mulf %20, %19 : vector<1x128xf32>
    %22 = arith.addf %17, %21 : vector<1x128xf32>
    %c3_12 = arith.constant 3 : index
    %c0_13 = arith.constant 0 : index
    %c0_14 = arith.constant 0 : index
    %c0_15 = arith.constant 0 : index
    %23 = vector.load %arg3[%c3_12, %c0_13, %c0_14, %c0_15] : memref<9x4x1x128xf32, #tpu.memory_space<vmem>>, vector<1x1x1x128xf32>
    %24 = vector.shape_cast %23 : vector<1x1x1x128xf32> to vector<1x128xf32>
    %25 = vector.broadcast %3 : f32 to vector<1x128xf32>
    %26 = arith.mulf %25, %24 : vector<1x128xf32>
    %27 = arith.addf %22, %26 : vector<1x128xf32>
    %c4_16 = arith.constant 4 : index
    %c0_17 = arith.constant 0 : index
    %c0_18 = arith.constant 0 : index
    %c0_19 = arith.constant 0 : index
    %28 = vector.load %arg3[%c4_16, %c0_17, %c0_18, %c0_19] : memref<9x4x1x128xf32, #tpu.memory_space<vmem>>, vector<1x1x1x128xf32>
    %29 = vector.shape_cast %28 : vector<1x1x1x128xf32> to vector<1x128xf32>
    %30 = vector.broadcast %4 : f32 to vector<1x128xf32>
    %31 = arith.mulf %30, %29 : vector<1x128xf32>
    %32 = arith.addf %27, %31 : vector<1x128xf32>
    %c5_20 = arith.constant 5 : index
    %c0_21 = arith.constant 0 : index
    %c0_22 = arith.constant 0 : index
    %c0_23 = arith.constant 0 : index
    %33 = vector.load %arg3[%c5_20, %c0_21, %c0_22, %c0_23] : memref<9x4x1x128xf32, #tpu.memory_space<vmem>>, vector<1x1x1x128xf32>
    %34 = vector.shape_cast %33 : vector<1x1x1x128xf32> to vector<1x128xf32>
    %35 = vector.broadcast %5 : f32 to vector<1x128xf32>
    %36 = arith.mulf %35, %34 : vector<1x128xf32>
    %37 = arith.addf %32, %36 : vector<1x128xf32>
    %c6_24 = arith.constant 6 : index
    %c0_25 = arith.constant 0 : index
    %c0_26 = arith.constant 0 : index
    %c0_27 = arith.constant 0 : index
    %38 = vector.load %arg3[%c6_24, %c0_25, %c0_26, %c0_27] : memref<9x4x1x128xf32, #tpu.memory_space<vmem>>, vector<1x1x1x128xf32>
    %39 = vector.shape_cast %38 : vector<1x1x1x128xf32> to vector<1x128xf32>
    %40 = vector.broadcast %6 : f32 to vector<1x128xf32>
    %41 = arith.mulf %40, %39 : vector<1x128xf32>
    %42 = arith.addf %37, %41 : vector<1x128xf32>
    %c7_28 = arith.constant 7 : index
    %c0_29 = arith.constant 0 : index
    %c0_30 = arith.constant 0 : index
    %c0_31 = arith.constant 0 : index
    %43 = vector.load %arg3[%c7_28, %c0_29, %c0_30, %c0_31] : memref<9x4x1x128xf32, #tpu.memory_space<vmem>>, vector<1x1x1x128xf32>
    %44 = vector.shape_cast %43 : vector<1x1x1x128xf32> to vector<1x128xf32>
    %45 = vector.broadcast %7 : f32 to vector<1x128xf32>
    %46 = arith.mulf %45, %44 : vector<1x128xf32>
    %47 = arith.addf %42, %46 : vector<1x128xf32>
    %c8_32 = arith.constant 8 : index
    %c0_33 = arith.constant 0 : index
    %c0_34 = arith.constant 0 : index
    %c0_35 = arith.constant 0 : index
    %48 = vector.load %arg3[%c8_32, %c0_33, %c0_34, %c0_35] : memref<9x4x1x128xf32, #tpu.memory_space<vmem>>, vector<1x1x1x128xf32>
    %49 = vector.shape_cast %48 : vector<1x1x1x128xf32> to vector<1x128xf32>
    %50 = vector.broadcast %8 : f32 to vector<1x128xf32>
    %51 = arith.mulf %50, %49 : vector<1x128xf32>
    %52 = arith.addf %47, %51 : vector<1x128xf32>
    %c0_36 = arith.constant 0 : index
    %c1_37 = arith.constant 1 : index
    %c0_38 = arith.constant 0 : index
    %c0_39 = arith.constant 0 : index
    %53 = vector.load %arg3[%c0_36, %c1_37, %c0_38, %c0_39] : memref<9x4x1x128xf32, #tpu.memory_space<vmem>>, vector<1x1x1x128xf32>
    %54 = vector.shape_cast %53 : vector<1x1x1x128xf32> to vector<1x128xf32>
    %55 = vector.broadcast %0 : f32 to vector<1x128xf32>
    %56 = arith.mulf %55, %54 : vector<1x128xf32>
    %c1_40 = arith.constant 1 : index
    %c1_41 = arith.constant 1 : index
    %c0_42 = arith.constant 0 : index
    %c0_43 = arith.constant 0 : index
    %57 = vector.load %arg3[%c1_40, %c1_41, %c0_42, %c0_43] : memref<9x4x1x128xf32, #tpu.memory_space<vmem>>, vector<1x1x1x128xf32>
    %58 = vector.shape_cast %57 : vector<1x1x1x128xf32> to vector<1x128xf32>
    %59 = vector.broadcast %1 : f32 to vector<1x128xf32>
    %60 = arith.mulf %59, %58 : vector<1x128xf32>
    %61 = arith.addf %56, %60 : vector<1x128xf32>
    %c2_44 = arith.constant 2 : index
    %c1_45 = arith.constant 1 : index
    %c0_46 = arith.constant 0 : index
    %c0_47 = arith.constant 0 : index
    %62 = vector.load %arg3[%c2_44, %c1_45, %c0_46, %c0_47] : memref<9x4x1x128xf32, #tpu.memory_space<vmem>>, vector<1x1x1x128xf32>
    %63 = vector.shape_cast %62 : vector<1x1x1x128xf32> to vector<1x128xf32>
    %64 = vector.broadcast %2 : f32 to vector<1x128xf32>
    %65 = arith.mulf %64, %63 : vector<1x128xf32>
    %66 = arith.addf %61, %65 : vector<1x128xf32>
    %c3_48 = arith.constant 3 : index
    %c1_49 = arith.constant 1 : index
    %c0_50 = arith.constant 0 : index
    %c0_51 = arith.constant 0 : index
    %67 = vector.load %arg3[%c3_48, %c1_49, %c0_50, %c0_51] : memref<9x4x1x128xf32, #tpu.memory_space<vmem>>, vector<1x1x1x128xf32>
    %68 = vector.shape_cast %67 : vector<1x1x1x128xf32> to vector<1x128xf32>
    %69 = vector.broadcast %3 : f32 to vector<1x128xf32>
    %70 = arith.mulf %69, %68 : vector<1x128xf32>
    %71 = arith.addf %66, %70 : vector<1x128xf32>
    %c4_52 = arith.constant 4 : index
    %c1_53 = arith.constant 1 : index
    %c0_54 = arith.constant 0 : index
    %c0_55 = arith.constant 0 : index
    %72 = vector.load %arg3[%c4_52, %c1_53, %c0_54, %c0_55] : memref<9x4x1x128xf32, #tpu.memory_space<vmem>>, vector<1x1x1x128xf32>
    %73 = vector.shape_cast %72 : vector<1x1x1x128xf32> to vector<1x128xf32>
    %74 = vector.broadcast %4 : f32 to vector<1x128xf32>
    %75 = arith.mulf %74, %73 : vector<1x128xf32>
    %76 = arith.addf %71, %75 : vector<1x128xf32>
    %c5_56 = arith.constant 5 : index
    %c1_57 = arith.constant 1 : index
    %c0_58 = arith.constant 0 : index
    %c0_59 = arith.constant 0 : index
    %77 = vector.load %arg3[%c5_56, %c1_57, %c0_58, %c0_59] : memref<9x4x1x128xf32, #tpu.memory_space<vmem>>, vector<1x1x1x128xf32>
    %78 = vector.shape_cast %77 : vector<1x1x1x128xf32> to vector<1x128xf32>
    %79 = vector.broadcast %5 : f32 to vector<1x128xf32>
    %80 = arith.mulf %79, %78 : vector<1x128xf32>
    %81 = arith.addf %76, %80 : vector<1x128xf32>
    %c6_60 = arith.constant 6 : index
    %c1_61 = arith.constant 1 : index
    %c0_62 = arith.constant 0 : index
    %c0_63 = arith.constant 0 : index
    %82 = vector.load %arg3[%c6_60, %c1_61, %c0_62, %c0_63] : memref<9x4x1x128xf32, #tpu.memory_space<vmem>>, vector<1x1x1x128xf32>
    %83 = vector.shape_cast %82 : vector<1x1x1x128xf32> to vector<1x128xf32>
    %84 = vector.broadcast %6 : f32 to vector<1x128xf32>
    %85 = arith.mulf %84, %83 : vector<1x128xf32>
    %86 = arith.addf %81, %85 : vector<1x128xf32>
    %c7_64 = arith.constant 7 : index
    %c1_65 = arith.constant 1 : index
    %c0_66 = arith.constant 0 : index
    %c0_67 = arith.constant 0 : index
    %87 = vector.load %arg3[%c7_64, %c1_65, %c0_66, %c0_67] : memref<9x4x1x128xf32, #tpu.memory_space<vmem>>, vector<1x1x1x128xf32>
    %88 = vector.shape_cast %87 : vector<1x1x1x128xf32> to vector<1x128xf32>
    %89 = vector.broadcast %7 : f32 to vector<1x128xf32>
    %90 = arith.mulf %89, %88 : vector<1x128xf32>
    %91 = arith.addf %86, %90 : vector<1x128xf32>
    %c8_68 = arith.constant 8 : index
    %c1_69 = arith.constant 1 : index
    %c0_70 = arith.constant 0 : index
    %c0_71 = arith.constant 0 : index
    %92 = vector.load %arg3[%c8_68, %c1_69, %c0_70, %c0_71] : memref<9x4x1x128xf32, #tpu.memory_space<vmem>>, vector<1x1x1x128xf32>
    %93 = vector.shape_cast %92 : vector<1x1x1x128xf32> to vector<1x128xf32>
    %94 = vector.broadcast %8 : f32 to vector<1x128xf32>
    %95 = arith.mulf %94, %93 : vector<1x128xf32>
    %96 = arith.addf %91, %95 : vector<1x128xf32>
    %97 = arith.maximumf %52, %96 : vector<1x128xf32>
    %c0_72 = arith.constant 0 : index
    %c2_73 = arith.constant 2 : index
    %c0_74 = arith.constant 0 : index
    %c0_75 = arith.constant 0 : index
    %98 = vector.load %arg3[%c0_72, %c2_73, %c0_74, %c0_75] : memref<9x4x1x128xf32, #tpu.memory_space<vmem>>, vector<1x1x1x128xf32>
    %99 = vector.shape_cast %98 : vector<1x1x1x128xf32> to vector<1x128xf32>
    %100 = vector.broadcast %0 : f32 to vector<1x128xf32>
    %101 = arith.mulf %100, %99 : vector<1x128xf32>
    %c1_76 = arith.constant 1 : index
    %c2_77 = arith.constant 2 : index
    %c0_78 = arith.constant 0 : index
    %c0_79 = arith.constant 0 : index
    %102 = vector.load %arg3[%c1_76, %c2_77, %c0_78, %c0_79] : memref<9x4x1x128xf32, #tpu.memory_space<vmem>>, vector<1x1x1x128xf32>
    %103 = vector.shape_cast %102 : vector<1x1x1x128xf32> to vector<1x128xf32>
    %104 = vector.broadcast %1 : f32 to vector<1x128xf32>
    %105 = arith.mulf %104, %103 : vector<1x128xf32>
    %106 = arith.addf %101, %105 : vector<1x128xf32>
    %c2_80 = arith.constant 2 : index
    %c2_81 = arith.constant 2 : index
    %c0_82 = arith.constant 0 : index
    %c0_83 = arith.constant 0 : index
    %107 = vector.load %arg3[%c2_80, %c2_81, %c0_82, %c0_83] : memref<9x4x1x128xf32, #tpu.memory_space<vmem>>, vector<1x1x1x128xf32>
    %108 = vector.shape_cast %107 : vector<1x1x1x128xf32> to vector<1x128xf32>
    %109 = vector.broadcast %2 : f32 to vector<1x128xf32>
    %110 = arith.mulf %109, %108 : vector<1x128xf32>
    %111 = arith.addf %106, %110 : vector<1x128xf32>
    %c3_84 = arith.constant 3 : index
    %c2_85 = arith.constant 2 : index
    %c0_86 = arith.constant 0 : index
    %c0_87 = arith.constant 0 : index
    %112 = vector.load %arg3[%c3_84, %c2_85, %c0_86, %c0_87] : memref<9x4x1x128xf32, #tpu.memory_space<vmem>>, vector<1x1x1x128xf32>
    %113 = vector.shape_cast %112 : vector<1x1x1x128xf32> to vector<1x128xf32>
    %114 = vector.broadcast %3 : f32 to vector<1x128xf32>
    %115 = arith.mulf %114, %113 : vector<1x128xf32>
    %116 = arith.addf %111, %115 : vector<1x128xf32>
    %c4_88 = arith.constant 4 : index
    %c2_89 = arith.constant 2 : index
    %c0_90 = arith.constant 0 : index
    %c0_91 = arith.constant 0 : index
    %117 = vector.load %arg3[%c4_88, %c2_89, %c0_90, %c0_91] : memref<9x4x1x128xf32, #tpu.memory_space<vmem>>, vector<1x1x1x128xf32>
    %118 = vector.shape_cast %117 : vector<1x1x1x128xf32> to vector<1x128xf32>
    %119 = vector.broadcast %4 : f32 to vector<1x128xf32>
    %120 = arith.mulf %119, %118 : vector<1x128xf32>
    %121 = arith.addf %116, %120 : vector<1x128xf32>
    %c5_92 = arith.constant 5 : index
    %c2_93 = arith.constant 2 : index
    %c0_94 = arith.constant 0 : index
    %c0_95 = arith.constant 0 : index
    %122 = vector.load %arg3[%c5_92, %c2_93, %c0_94, %c0_95] : memref<9x4x1x128xf32, #tpu.memory_space<vmem>>, vector<1x1x1x128xf32>
    %123 = vector.shape_cast %122 : vector<1x1x1x128xf32> to vector<1x128xf32>
    %124 = vector.broadcast %5 : f32 to vector<1x128xf32>
    %125 = arith.mulf %124, %123 : vector<1x128xf32>
    %126 = arith.addf %121, %125 : vector<1x128xf32>
    %c6_96 = arith.constant 6 : index
    %c2_97 = arith.constant 2 : index
    %c0_98 = arith.constant 0 : index
    %c0_99 = arith.constant 0 : index
    %127 = vector.load %arg3[%c6_96, %c2_97, %c0_98, %c0_99] : memref<9x4x1x128xf32, #tpu.memory_space<vmem>>, vector<1x1x1x128xf32>
    %128 = vector.shape_cast %127 : vector<1x1x1x128xf32> to vector<1x128xf32>
    %129 = vector.broadcast %6 : f32 to vector<1x128xf32>
    %130 = arith.mulf %129, %128 : vector<1x128xf32>
    %131 = arith.addf %126, %130 : vector<1x128xf32>
    %c7_100 = arith.constant 7 : index
    %c2_101 = arith.constant 2 : index
    %c0_102 = arith.constant 0 : index
    %c0_103 = arith.constant 0 : index
    %132 = vector.load %arg3[%c7_100, %c2_101, %c0_102, %c0_103] : memref<9x4x1x128xf32, #tpu.memory_space<vmem>>, vector<1x1x1x128xf32>
    %133 = vector.shape_cast %132 : vector<1x1x1x128xf32> to vector<1x128xf32>
    %134 = vector.broadcast %7 : f32 to vector<1x128xf32>
    %135 = arith.mulf %134, %133 : vector<1x128xf32>
    %136 = arith.addf %131, %135 : vector<1x128xf32>
    %c8_104 = arith.constant 8 : index
    %c2_105 = arith.constant 2 : index
    %c0_106 = arith.constant 0 : index
    %c0_107 = arith.constant 0 : index
    %137 = vector.load %arg3[%c8_104, %c2_105, %c0_106, %c0_107] : memref<9x4x1x128xf32, #tpu.memory_space<vmem>>, vector<1x1x1x128xf32>
    %138 = vector.shape_cast %137 : vector<1x1x1x128xf32> to vector<1x128xf32>
    %139 = vector.broadcast %8 : f32 to vector<1x128xf32>
    %140 = arith.mulf %139, %138 : vector<1x128xf32>
    %141 = arith.addf %136, %140 : vector<1x128xf32>
    %142 = arith.maximumf %97, %141 : vector<1x128xf32>
    %c0_108 = arith.constant 0 : index
    %c3_109 = arith.constant 3 : index
    %c0_110 = arith.constant 0 : index
    %c0_111 = arith.constant 0 : index
    %143 = vector.load %arg3[%c0_108, %c3_109, %c0_110, %c0_111] : memref<9x4x1x128xf32, #tpu.memory_space<vmem>>, vector<1x1x1x128xf32>
    %144 = vector.shape_cast %143 : vector<1x1x1x128xf32> to vector<1x128xf32>
    %145 = vector.broadcast %0 : f32 to vector<1x128xf32>
    %146 = arith.mulf %145, %144 : vector<1x128xf32>
    %c1_112 = arith.constant 1 : index
    %c3_113 = arith.constant 3 : index
    %c0_114 = arith.constant 0 : index
    %c0_115 = arith.constant 0 : index
    %147 = vector.load %arg3[%c1_112, %c3_113, %c0_114, %c0_115] : memref<9x4x1x128xf32, #tpu.memory_space<vmem>>, vector<1x1x1x128xf32>
    %148 = vector.shape_cast %147 : vector<1x1x1x128xf32> to vector<1x128xf32>
    %149 = vector.broadcast %1 : f32 to vector<1x128xf32>
    %150 = arith.mulf %149, %148 : vector<1x128xf32>
    %151 = arith.addf %146, %150 : vector<1x128xf32>
    %c2_116 = arith.constant 2 : index
    %c3_117 = arith.constant 3 : index
    %c0_118 = arith.constant 0 : index
    %c0_119 = arith.constant 0 : index
    %152 = vector.load %arg3[%c2_116, %c3_117, %c0_118, %c0_119] : memref<9x4x1x128xf32, #tpu.memory_space<vmem>>, vector<1x1x1x128xf32>
    %153 = vector.shape_cast %152 : vector<1x1x1x128xf32> to vector<1x128xf32>
    %154 = vector.broadcast %2 : f32 to vector<1x128xf32>
    %155 = arith.mulf %154, %153 : vector<1x128xf32>
    %156 = arith.addf %151, %155 : vector<1x128xf32>
    %c3_120 = arith.constant 3 : index
    %c3_121 = arith.constant 3 : index
    %c0_122 = arith.constant 0 : index
    %c0_123 = arith.constant 0 : index
    %157 = vector.load %arg3[%c3_120, %c3_121, %c0_122, %c0_123] : memref<9x4x1x128xf32, #tpu.memory_space<vmem>>, vector<1x1x1x128xf32>
    %158 = vector.shape_cast %157 : vector<1x1x1x128xf32> to vector<1x128xf32>
    %159 = vector.broadcast %3 : f32 to vector<1x128xf32>
    %160 = arith.mulf %159, %158 : vector<1x128xf32>
    %161 = arith.addf %156, %160 : vector<1x128xf32>
    %c4_124 = arith.constant 4 : index
    %c3_125 = arith.constant 3 : index
    %c0_126 = arith.constant 0 : index
    %c0_127 = arith.constant 0 : index
    %162 = vector.load %arg3[%c4_124, %c3_125, %c0_126, %c0_127] : memref<9x4x1x128xf32, #tpu.memory_space<vmem>>, vector<1x1x1x128xf32>
    %163 = vector.shape_cast %162 : vector<1x1x1x128xf32> to vector<1x128xf32>
    %164 = vector.broadcast %4 : f32 to vector<1x128xf32>
    %165 = arith.mulf %164, %163 : vector<1x128xf32>
    %166 = arith.addf %161, %165 : vector<1x128xf32>
    %c5_128 = arith.constant 5 : index
    %c3_129 = arith.constant 3 : index
    %c0_130 = arith.constant 0 : index
    %c0_131 = arith.constant 0 : index
    %167 = vector.load %arg3[%c5_128, %c3_129, %c0_130, %c0_131] : memref<9x4x1x128xf32, #tpu.memory_space<vmem>>, vector<1x1x1x128xf32>
    %168 = vector.shape_cast %167 : vector<1x1x1x128xf32> to vector<1x128xf32>
    %169 = vector.broadcast %5 : f32 to vector<1x128xf32>
    %170 = arith.mulf %169, %168 : vector<1x128xf32>
    %171 = arith.addf %166, %170 : vector<1x128xf32>
    %c6_132 = arith.constant 6 : index
    %c3_133 = arith.constant 3 : index
    %c0_134 = arith.constant 0 : index
    %c0_135 = arith.constant 0 : index
    %172 = vector.load %arg3[%c6_132, %c3_133, %c0_134, %c0_135] : memref<9x4x1x128xf32, #tpu.memory_space<vmem>>, vector<1x1x1x128xf32>
    %173 = vector.shape_cast %172 : vector<1x1x1x128xf32> to vector<1x128xf32>
    %174 = vector.broadcast %6 : f32 to vector<1x128xf32>
    %175 = arith.mulf %174, %173 : vector<1x128xf32>
    %176 = arith.addf %171, %175 : vector<1x128xf32>
    %c7_136 = arith.constant 7 : index
    %c3_137 = arith.constant 3 : index
    %c0_138 = arith.constant 0 : index
    %c0_139 = arith.constant 0 : index
    %177 = vector.load %arg3[%c7_136, %c3_137, %c0_138, %c0_139] : memref<9x4x1x128xf32, #tpu.memory_space<vmem>>, vector<1x1x1x128xf32>
    %178 = vector.shape_cast %177 : vector<1x1x1x128xf32> to vector<1x128xf32>
    %179 = vector.broadcast %7 : f32 to vector<1x128xf32>
    %180 = arith.mulf %179, %178 : vector<1x128xf32>
    %181 = arith.addf %176, %180 : vector<1x128xf32>
    %c8_140 = arith.constant 8 : index
    %c3_141 = arith.constant 3 : index
    %c0_142 = arith.constant 0 : index
    %c0_143 = arith.constant 0 : index
    %182 = vector.load %arg3[%c8_140, %c3_141, %c0_142, %c0_143] : memref<9x4x1x128xf32, #tpu.memory_space<vmem>>, vector<1x1x1x128xf32>
    %183 = vector.shape_cast %182 : vector<1x1x1x128xf32> to vector<1x128xf32>
    %184 = vector.broadcast %8 : f32 to vector<1x128xf32>
    %185 = arith.mulf %184, %183 : vector<1x128xf32>
    %186 = arith.addf %181, %185 : vector<1x128xf32>
    %187 = arith.maximumf %142, %186 : vector<1x128xf32>
    %c0_144 = arith.constant 0 : index
    %188 = memref.load %arg2[%c0_144] : memref<1xf32, #tpu.memory_space<smem>>
    %189 = vector.broadcast %188 : f32 to vector<1x128xf32>
    %190 = arith.addf %187, %189 : vector<1x128xf32>
    %191 = math.tanh %190 : vector<1x128xf32>
    %c0_145 = arith.constant 0 : index
    %c0_146 = arith.constant 0 : index
    %192 = vector.load %arg4[%c0_145, %c0_146] : memref<1x128xf32, #tpu.memory_space<vmem>>, vector<1x128xf32>
    tpu.vector_store %arg4[%c0_145, %c0_146], %191 {strides = array<i32>} : memref<1x128xf32, #tpu.memory_space<vmem>>, vector<1x128xf32>,
    return
  }
  func.func @transform_0(%arg0: i32) -> i32 {
    %c0_i32 = arith.constant 0 : i32
    %c0_i32_0 = arith.constant 0 : i32
    return %c0_i32 : i32
  }
  func.func @transform_1(%arg0: i32) -> i32 {
    %c0_i32 = arith.constant 0 : i32
    %c0_i32_0 = arith.constant 0 : i32
    return %c0_i32 : i32
  }
  func.func @transform_2(%arg0: i32) -> (i32, i32, i32, i32) {
    %c0_i32 = arith.constant 0 : i32
    %c0_i32_0 = arith.constant 0 : i32
    %c0_i32_1 = arith.constant 0 : i32
    %c0_i32_2 = arith.constant 0 : i32
    return %c0_i32, %c0_i32_0, %arg0, %c0_i32_1 : i32, i32, i32, i32
  }
  func.func @transform_3(%arg0: i32) -> (i32, i32) {
    %c0_i32 = arith.constant 0 : i32
    %c0_i32_0 = arith.constant 0 : i32
    return %arg0, %c0_i32 : i32, i32
  }
}

</mosaic_0001>

<bundles_post_ra>
// kernel: tpu_custom_call.1
= control target key start
LH: loop header
LB: loop body
LE: loop exit
PB: predicated region body
PF: predicated region fallthrough
CT: control target
= control target key end

     0   :  { %9 = vsyncpa [#allocation6], 0  ;;  %s388_s0 = inlined_call_operand.vmem [shape: f32[9], index: 0, kind: input, shape index: {}]   ;;  %s389_s1 = inlined_call_operand.<no memory space> [shape: f32[1], index: 1, kind: input, shape index: {}]   ;;  %s390_s2 = inlined_call_operand.hbm [shape: f32[9,4,1,128], index: 2, kind: input, shape index: {}]   ;;  %s391_s3 = inlined_call_operand.hbm [shape: f32[1,128], index: 3, kind: output, shape index: {}]  }
   0x1   :  { %10 = vsyncpa [#allocation4], 0 }
   0x2   :  { %11 = vsyncpa [#allocation5], 0  ;;  %s17_s14 = sshll.u32 %s388_s0, 4  ;;  %s27_s17 = sshll.u32 %s390_s2, 4  ;;  %s18_s14 = int_to_ptr.vmem [resolvable:$true] %s17_s14  ;;  %s28_s17 = int_to_ptr.hbm [resolvable:$true] %s27_s17 }
   0x3   :  { %s309_s18 = smov [#allocation3]   ;;  %s310_s19 = smov [#allocation7]  }
   0x4   :  { %20 = dma.vmem_to_smem %s18_s14, 16, %s309_s18, [#allocation6]  }
   0x5   :  { %s29_s20 = sshll.u32 %s310_s19, 4  ;;  %s311_s21 = smov 16   ;;  %s30_s20 = int_to_ptr.vmem [resolvable:$true] %s29_s20 }
   0x6   :  { %s312_s22 = smov 1  }
   0x7   :  { %35 = dma.hbm_to_vmem [thread:$0]  %s28_s17, 576, %s30_s20, [#allocation4], %s311_s21, %s311_s21, %s312_s22  }
   0x8   :  { %303 = dma.done.wait [#allocation6], 16  }
   0x9   :  { %304 = vsyncadd [#allocation6], 4294967280 }
   0xa   :  { %305 = dma.done.wait [#allocation4], 576  }
   0xb   :  { %306 = vsyncadd [#allocation4], 4294966720 }
   0xc   :  { %44 = sfence }
   0xd   :  { %s45_s0 = sld [smem:[#allocation3]]  ;;  %v54_v0 = vld [vmem:[#allocation7] sm:$0x1]  ;;  %v98_v1 = vld [vmem:[#allocation7 + $0x1] sm:$0x1]  ;;  %s313_s5 = smov [#allocation8]  }
   0xe   :  { %s228_s23 = sld [smem:[#allocation3 + $0x1]]  ;;  %v58_v2 = vld [vmem:[#allocation7 + $0x4] sm:$0x1]  ;;  %v101_v3 = vld [vmem:[#allocation7 + $0x5] sm:$0x1]  ;;  %s215_s6 = sshll.u32 %s313_s5, 4  ;;  %s216_s6 = int_to_ptr.vmem [resolvable:$true] %s215_s6 }
   0xf   :  { %s229_s24 = sld [smem:[#allocation3 + $0x2]]  ;;  %v63_v5 = vld [vmem:[#allocation7 + $0x8] sm:$0x1]  ;;  %v105_v6 = vld [vmem:[#allocation7 + $0x9] sm:$0x1]  ;;  %s217_s9 = sshll.u32 %s391_s3, 4  ;;  %s218_s9 = int_to_ptr.hbm [resolvable:$true] %s217_s9 }
  0x10   :  { %s230_s25 = sld [smem:[#allocation3 + $0x3]]  ;;  %v68_v9 = vld [vmem:[#allocation7 + $0xc] sm:$0x1]  ;;  %v73_v13 = vld [vmem:[#allocation7 + $0x10] sm:$0x1] }
  0x11   :  { %s231_s26 = sld [smem:[#allocation3 + $0x4]]  ;;  %v109_v15 = vld [vmem:[#allocation7 + $0xd] sm:$0x1]  ;;  %v113_v19 = vld [vmem:[#allocation7 + $0x11] sm:$0x1] }
  0x12   :  { %s232_s2 = sld [smem:[#allocation3 + $0x5]]  ;;  %v78_v23 = vld [vmem:[#allocation7 + $0x14] sm:$0x1]  ;;  %v117_v28 = vld [vmem:[#allocation7 + $0x15] sm:$0x1] }
  0x13   :  { %s233_s27 = sld [smem:[#allocation3 + $0x6]]  ;;  %v340_v4 = vstv %s45_s0  ;;  %v83_v30 = vld [vmem:[#allocation7 + $0x18] sm:$0x1]  ;;  %v121_v34 = vld [vmem:[#allocation7 + $0x19] sm:$0x1] }
  0x14   :  { %s342_s28 = sld [smem:[#allocation3 + $0x7]]  ;;  %v56_v7 = vmul.f32 %v340_v4, %v54_v0  ;;  %v59_v8 = vstv %s228_s23  ;;  %v99_v10 = vmul.f32 %v98_v1, %v340_v4  ;;  %v134_v35 = vld [vmem:[#allocation7 + $0x2] sm:$0x1]  ;;  %v137_v37 = vld [vmem:[#allocation7 + $0x6] sm:$0x1] }
  0x15   :  { %v60_v11 = vmul.f32 %v59_v8, %v58_v2  ;;  %v64_v12 = vstv %s229_s24  ;;  %v102_v14 = vmul.f32 %v101_v3, %v59_v8  ;;  %s346_s29 = sld [smem:[#allocation3 + $0x8]]  ;;  %v141_v38 = vld [vmem:[#allocation7 + $0xa] sm:$0x1]  ;;  %v88_v40 = vld [vmem:[#allocation7 + $0x1c] sm:$0x1]  ;;  %v135_v47 = vmul.f32 %v134_v35, %v340_v4 }
  0x16   :  { %v65_v16 = vmul.f32 %v64_v12, %v63_v5  ;;  %v348_v17 = vstv %s230_s25  ;;  %v106_v18 = vmul.f32 %v105_v6, %v64_v12  ;;  %v125_v44 = vld [vmem:[#allocation7 + $0x1d] sm:$0x1]  ;;  %v145_v48 = vld [vmem:[#allocation7 + $0xe] sm:$0x1]  ;;  %v138_v51 = vmul.f32 %v137_v37, %v59_v8  ;;  %v170_v53 = vld [vmem:[#allocation7 + $0x3] sm:$0x1] }
  0x17   :  { %v61_v20 = vadd.f32 %v60_v11, %v56_v7  ;;  %v70_v21 = vmul.f32 %v348_v17, %v68_v9  ;;  %v351_v22 = vstv %s231_s26  ;;  %v103_v24 = vadd.f32 %v102_v14, %v99_v10  ;;  %v173_v54 = vld [vmem:[#allocation7 + $0x7] sm:$0x1]  ;;  %v177_v55 = vld [vmem:[#allocation7 + $0xb] sm:$0x1]  ;;  %v149_v59 = vld [vmem:[#allocation7 + $0x12] sm:$0x1] }
  0x18   :  { %v75_v25 = vmul.f32 %v351_v22, %v73_v13  ;;  %v354_v26 = vstv %s232_s2  ;;  %v110_v27 = vmul.f32 %v109_v15, %v348_v17  ;;  %v114_v33 = vmul.f32 %v113_v19, %v351_v22  ;;  %v93_v61 = vld [vmem:[#allocation7 + $0x20] sm:$0x1]  ;;  %v129_v63 = vld [vmem:[#allocation7 + $0x21] sm:$0x1]  ;;  %v181_v2 = vld [vmem:[#allocation7 + $0xf] sm:$0x1] }
  0x19   :  { %v66_v29 = vadd.f32 %v65_v16, %v61_v20  ;;  %v357_v31 = vstv %s233_s27  ;;  %v107_v32 = vadd.f32 %v106_v18, %v103_v24  ;;  %v80_v36 = vmul.f32 %v354_v26, %v78_v23  ;;  %v153_v3 = vld [vmem:[#allocation7 + $0x16] sm:$0x1]  ;;  %v185_v14 = vld [vmem:[#allocation7 + $0x13] sm:$0x1]  ;;  %v157_v18 = vld [vmem:[#allocation7 + $0x1a] sm:$0x1] }
  0x1a   :  { %v362_v41 = vstv %s342_s28  ;;  %v118_v43 = vmul.f32 %v117_v28, %v354_v26  ;;  %v85_v45 = vmul.f32 %v357_v31, %v83_v30  ;;  %v122_v46 = vmul.f32 %v121_v34, %v357_v31  ;;  %v193_v30 = vld [vmem:[#allocation7 + $0x1b] sm:$0x1] }
  0x1b   :  { %v71_v39 = vadd.f32 %v70_v21, %v66_v29  ;;  %v111_v42 = vadd.f32 %v110_v27, %v107_v32  ;;  %v142_v52 = vmul.f32 %v141_v38, %v64_v12  ;;  %v90_v56 = vmul.f32 %v362_v41, %v88_v40  ;;  %v165_v32 = vld [vmem:[#allocation7 + $0x22] sm:$0x1]  ;;  %v197_v38 = vld [vmem:[#allocation7 + $0x1f] sm:$0x1] }
  0x1c   :  { %v94_v57 = vstv %s346_s29  ;;  %v126_v58 = vmul.f32 %v125_v44, %v362_v41  ;;  %v139_v0 = vadd.f32 %v138_v51, %v135_v47  ;;  %v146_v1 = vmul.f32 %v145_v48, %v348_v17 }
  0x1d   :  { %v76_v49 = vadd.f32 %v75_v25, %v71_v39  ;;  %v115_v50 = vadd.f32 %v114_v33, %v111_v42  ;;  %v171_v5 = vmul.f32 %v170_v53, %v340_v4  ;;  %v174_v6 = vmul.f32 %v173_v54, %v59_v8  ;;  %v189_v4 = vld [vmem:[#allocation7 + $0x17] sm:$0x1]  ;;  %v161_v8 = vld [vmem:[#allocation7 + $0x1e] sm:$0x1] }
  0x1e   :  { %v178_v7 = vmul.f32 %v177_v55, %v64_v12  ;;  %v143_v11 = vadd.f32 %v142_v52, %v139_v0  ;;  %v150_v13 = vmul.f32 %v149_v59, %v351_v22  ;;  %v95_v15 = vmul.f32 %v94_v57, %v93_v61 }
  0x1f   :  { %v81_v60 = vadd.f32 %v80_v36, %v76_v49  ;;  %v119_v62 = vadd.f32 %v118_v43, %v115_v50  ;;  %v130_v16 = vmul.f32 %v129_v63, %v94_v57  ;;  %v175_v19 = vadd.f32 %v174_v6, %v171_v5 }
  0x20   :  { %v182_v20 = vmul.f32 %v181_v2, %v348_v17  ;;  %v147_v24 = vadd.f32 %v146_v1, %v143_v11  ;;  %v154_v25 = vmul.f32 %v153_v3, %v354_v26  ;;  %v186_v27 = vmul.f32 %v185_v14, %v351_v22  ;;  %v201_v22 = vld [vmem:[#allocation7 + $0x23] sm:$0x1] }
  0x21   :  { %v86_v9 = vadd.f32 %v85_v45, %v81_v60  ;;  %v123_v10 = vadd.f32 %v122_v46, %v119_v62  ;;  %v179_v12 = vadd.f32 %v178_v7, %v175_v19  ;;  %v158_v29 = vmul.f32 %v157_v18, %v357_v31 }
  0x22   :  { %v151_v28 = vadd.f32 %v150_v13, %v147_v24  ;;  %v190_v34 = vmul.f32 %v189_v4, %v354_v26  ;;  %v162_v37 = vmul.f32 %v161_v8, %v362_v41  ;;  %v194_v40 = vmul.f32 %v193_v30, %v357_v31 }
  0x23   :  { %v91_v21 = vadd.f32 %v90_v56, %v86_v9  ;;  %v127_v23 = vadd.f32 %v126_v58, %v123_v10  ;;  %v183_v33 = vadd.f32 %v182_v20, %v179_v12  ;;  %v166_v43 = vmul.f32 %v165_v32, %v94_v57 }
  0x24   :  { %v155_v36 = vadd.f32 %v154_v25, %v151_v28  ;;  %v198_v45 = vmul.f32 %v197_v38, %v362_v41  ;;  %v202_v49 = vmul.f32 %v201_v22, %v94_v57  ;;  %v206_v53 = vstv %s389_s1 }
  0x25   :  { %v96_v35 = vadd.f32 %v95_v15, %v91_v21  ;;  %v131_v17 = vadd.f32 %v130_v16, %v127_v23  ;;  %v187_v39 = vadd.f32 %v186_v27, %v183_v33 }
  0x26   :  { %v159_v42 = vadd.f32 %v158_v29, %v155_v36 }
  0x27   :  { %v191_v44 = vadd.f32 %v190_v34, %v187_v39  ;;  %v132_v46 = vmax.f32 %v96_v35, %v131_v17 }
  0x28   :  { %v163_v47 = vadd.f32 %v162_v37, %v159_v42 }
  0x29   :  { %v195_v48 = vadd.f32 %v194_v40, %v191_v44 }
  0x2a   :  { %v167_v26 = vadd.f32 %v166_v43, %v163_v47 }
  0x2b   :  { %v199_v50 = vadd.f32 %v198_v45, %v195_v48 }
  0x2c   :  { %v168_v51 = vmax.f32 %v132_v46, %v167_v26 }
  0x2d   :  { %v203_v52 = vadd.f32 %v202_v49, %v199_v50 }
  0x2f   :  { %v204_v54 = vmax.f32 %v168_v51, %v203_v52 }
  0x31   :  { %v207_v31 = vadd.f32 %v206_v53, %v204_v54 }
  0x33   :  { %241 = vtanh.f32 %v207_v31 }
  0x39   :  { %v242_v41 = vpop.eup %241 }
  0x3a   :  { %209 = vst [vmem:[#allocation8] sm:$0x1] %v242_v41 }
  0x3b   :  { %220 = dma.vmem_to_hbm [thread:$0]  %s216_s6, 16, %s218_s9, [#allocation5]  }
  0x3c   :  { %307 = dma.done.wait [#allocation5], 16  }
  0x3d   :  { %308 = vsyncadd [#allocation5], 4294967280 }
  0x3e   :  { %225 = vsyncpa [#allocation4], 1 }
  0x3f   :  { %226 = vsyncpa [#allocation5], 1 }
  0x40   :  { %227 = vsyncpa [#allocation6], 1 }

</bundles_post_ra>
